<compile_context>
chip_gen: v7x
topology: tpu7x:2x2x1
jax: 0.10.0
libtpu: 0.0.40
codegen_flags: <defaults>
</compile_context>

<pallas_src>
import jax
import jax.numpy as jnp
from jax import lax
from jax.experimental import pallas as pl
from jax.experimental.pallas import tpu as pltpu


_LANE = 512                           # lane width of flattened slab (multiple of 128)
_MAX_BLOCK_BYTES = 2 * 1024 * 1024    # ~2 MiB per input per grid step
_MAX_BLOCK_ROWS = 512
_NUM_SPLITS = 2                       # leading "parallel" grid axis (2 TCs on v7x)


def _make_bce_kernel(lane, tm, inner, valid, weighted):
    """valid = true element count (unweighted) or true row count (weighted)."""

    def kernel(*refs):
        if weighted:
            x_ref, t_ref, w_ref, out_ref, acc_ref = refs
        else:
            x_ref, t_ref, out_ref, acc_ref = refs

        s = pl.program_id(0)          # parallel split
        i = pl.program_id(1)          # reduction step within the split

        @pl.when(i == 0)
        def _():
            acc_ref[...] = jnp.zeros_like(acc_ref)

        x = x_ref[...]
        t = t_ref[...]
        z = (t > 0.15).astype(jnp.float32)
        # numerically stable BCE-with-logits (same formula as PyTorch)
        loss = jnp.maximum(x, 0.0) - x * z + jnp.log1p(jnp.exp(-jnp.abs(x)))

        row0 = (s * inner + i) * tm
        r = lax.broadcasted_iota(jnp.int32, (tm, lane), 0)
        if weighted:
            loss = loss * w_ref[...]                    # (1, lane) resident weight row
            keep = (row0 + r) < valid                   # mask padded rows
        else:
            c = lax.broadcasted_iota(jnp.int32, (tm, lane), 1)
            keep = (row0 + r) * lane + c < valid        # mask padded elements

        # block-shaped accumulator: pure element-wise adds in the hot loop
        acc_ref[...] += jnp.where(keep, loss, 0.0)

        @pl.when(i == pl.num_programs(1) - 1)
        def _():
            out_ref[...] = jnp.full((1, 128), jnp.sum(acc_ref[...]),
                                    dtype=out_ref.dtype)

    return kernel


def _row_tile(rows_needed, lane):
    tm = _MAX_BLOCK_BYTES // (lane * 4)
    tm = max(8, min(_MAX_BLOCK_ROWS, (tm // 8) * 8))
    tm = min(tm, max(8, ((rows_needed + 7) // 8) * 8))
    return tm


def _launch(kernel, args, in_specs, tm, lane, inner):
    partials = pl.pallas_call(
        kernel,
        out_shape=jax.ShapeDtypeStruct((1, _NUM_SPLITS * 128), jnp.float32),
        grid_spec=pltpu.PrefetchScalarGridSpec(
            num_scalar_prefetch=0,
            grid=(_NUM_SPLITS, inner),
            in_specs=in_specs,
            out_specs=pl.BlockSpec((1, 128), lambda s, i: (0, s)),
            scratch_shapes=[pltpu.VMEM((tm, lane), jnp.float32)],
        ),
        compiler_params=pltpu.CompilerParams(
            dimension_semantics=("parallel", "arbitrary"),
            vmem_limit_bytes=32 * 1024 * 1024,
        ),
    )(*args)
    # one partial per split (value replicated across its 128-lane output block)
    return jnp.sum(partials.reshape(_NUM_SPLITS, 128)[:, 0])


def bce_forward(output, target, mask=None, weights=None):
    """Pallas implementation of BCE.forward(output, target, mask, weights)."""
    if mask is not None:
        # TODO(synk): dynamic-shape boolean masking has no Pallas equivalent;
        # done with a concrete mask in wrapper glue, matching the reference.
        keep = jnp.logical_not(mask)
        output = output[:, keep]
        target = target[:, keep]

    B, N, T = output.shape
    count = B * N * T                 # torch .mean() divisor (independent of weights)

    if weights is None:
        # Lane-dense layout: flatten everything to a (rows, 512) slab.
        x = output.reshape(-1).astype(jnp.float32)
        t = target.reshape(-1).astype(jnp.float32)
        total = x.shape[0]
        lane = _LANE
        rows_needed = -(-total // lane)
        tm = _row_tile(rows_needed, lane)
        inner = -(-rows_needed // (tm * _NUM_SPLITS))
        padded_rows = _NUM_SPLITS * inner * tm
        pad = padded_rows * lane - total
        x = jnp.pad(x, (0, pad)).reshape(padded_rows, lane)
        t = jnp.pad(t, (0, pad)).reshape(padded_rows, lane)

        kernel = _make_bce_kernel(lane, tm, inner, total, weighted=False)
        in_specs = [
            pl.BlockSpec((tm, lane), lambda s, i: (s * inner + i, 0)),
            pl.BlockSpec((tm, lane), lambda s, i: (s * inner + i, 0)),
        ]
        total_sum = _launch(kernel, (x, t), in_specs, tm, lane, inner)
    else:
        # Put N on the lane axis so weights[None, :, None] becomes one (1, N_pad) row.
        lane = max(128, ((N + 127) // 128) * 128)
        rows = B * T
        xw = jnp.transpose(output, (0, 2, 1)).reshape(rows, N).astype(jnp.float32)
        tw = jnp.transpose(target, (0, 2, 1)).reshape(rows, N).astype(jnp.float32)
        w = jnp.pad(weights.astype(jnp.float32), (0, lane - N)).reshape(1, lane)

        tm = _row_tile(rows, lane)
        inner = -(-rows // (tm * _NUM_SPLITS))
        padded_rows = _NUM_SPLITS * inner * tm
        xw = jnp.pad(xw, ((0, padded_rows - rows), (0, lane - N)))
        tw = jnp.pad(tw, ((0, padded_rows - rows), (0, lane - N)))

        kernel = _make_bce_kernel(lane, tm, inner, rows, weighted=True)
        in_specs = [
            pl.BlockSpec((tm, lane), lambda s, i: (s * inner + i, 0)),
            pl.BlockSpec((tm, lane), lambda s, i: (s * inner + i, 0)),
            pl.BlockSpec((1, lane), lambda s, i: (0, 0)),   # resident weight row
        ]
        total_sum = _launch(kernel, (xw, tw, w), in_specs, tm, lane, inner)

    return total_sum / jnp.float32(count)


def _bce_reference(output, target, mask=None, weights=None):
    """Pure-JAX reference reproducing the PyTorch module."""
    if mask is not None:
        keep = jnp.logical_not(mask)
        output = output[:, keep]
        target = target[:, keep]
    z = (target > 0.15).astype(jnp.float32)
    x = output.astype(jnp.float32)
    loss = jnp.maximum(x, 0.0) - x * z + jnp.log1p(jnp.exp(-jnp.abs(x)))
    if weights is not None:
        loss = loss * weights[None, :, None]
    return jnp.mean(loss)


if __name__ == "__main__":
    key = jax.random.PRNGKey(0)
    k1, k2, k3 = jax.random.split(key, 3)

    B, N, T = 2, 16, 8   # (batch, nodes, time) — shapes implied by mpnnlstm usage
    output = jax.random.normal(k1, (B, N, T), dtype=jnp.float32)
    target = jax.random.uniform(k2, (B, N, T), dtype=jnp.float32)
    weights = jax.random.uniform(k3, (N,), dtype=jnp.float32)

    # no-weights path
    got = jax.block_until_ready(bce_forward(output, target))
    ref = _bce_reference(output, target)
    assert jnp.allclose(got, ref, atol=1e-5, rtol=1e-5), (got, ref)

    # weighted path
    got_w = jax.block_until_ready(bce_forward(output, target, weights=weights))
    ref_w = _bce_reference(output, target, weights=weights)
    assert jnp.allclose(got_w, ref_w, atol=1e-5, rtol=1e-5), (got_w, ref_w)

    # mask path (wrapper-side boolean indexing with a concrete mask)
    node_mask = jnp.array([False, True] * (N // 2))
    got_m = jax.block_until_ready(bce_forward(output, target, mask=node_mask))
    ref_m = _bce_reference(output, target, mask=node_mask)
    assert jnp.allclose(got_m, ref_m, atol=1e-5, rtol=1e-5), (got_m, ref_m)

    # odd, non-aligned shapes exercise the padding + masking logic
    B2, N2, T2 = 3, 37, 29
    o2 = jax.random.normal(k1, (B2, N2, T2), dtype=jnp.float32)
    t2 = jax.random.uniform(k2, (B2, N2, T2), dtype=jnp.float32)
    w2 = jax.random.uniform(k3, (N2,), dtype=jnp.float32)
    got2 = jax.block_until_ready(bce_forward(o2, t2))
    ref2 = _bce_reference(o2, t2)
    assert jnp.allclose(got2, ref2, atol=1e-5, rtol=1e-5), (got2, ref2)
    got2w = jax.block_until_ready(bce_forward(o2, t2, weights=w2))
    ref2w = _bce_reference(o2, t2, weights=w2)
    assert jnp.allclose(got2w, ref2w, atol=1e-5, rtol=1e-5), (got2w, ref2w)

    print("KERNEL_OK")
</pallas_src>

<mosaic_0001>
module attributes {stable_mosaic.version = 11 : i64} {
  func.func @kernel(%arg0: i32, %arg1: i32, %arg2: memref<8x512xf32, #tpu.memory_space<vmem>>, %arg3: memref<8x512xf32, #tpu.memory_space<vmem>>, %arg4: memref<1x128xf32, #tpu.memory_space<vmem>>, %arg5: memref<8x512xf32, #tpu.memory_space<vmem>>) attributes {dimension_semantics = [#tpu.dimension_semantics<parallel>, #tpu.dimension_semantics<arbitrary>], iteration_bounds = array<i64: 2, 1>, scalar_prefetch = 0 : i64, scratch_operands = 1 : i64, tpu.core_type = #tpu.core_type<tc>, window_params = [{transform_indices = @transform_0, window_bounds = array<i64: 8, 512>}, {transform_indices = @transform_1, window_bounds = array<i64: 8, 512>}, {transform_indices = @transform_2, window_bounds = array<i64: 1, 128>}]} {
    %c0_i32 = arith.constant 0 : i32
    %0 = arith.cmpi eq, %arg1, %c0_i32 : i32
    %1 = arith.extui %0 : i1 to i32
    %c0_i32_0 = arith.constant 0 : i32
    %2 = arith.cmpi ne, %1, %c0_i32_0 : i32
    scf.if %2 {
      %cst_13 = arith.constant 0.000000e+00 : f32
      %39 = vector.broadcast %cst_13 : f32 to vector<8x512xf32>
      %c0_14 = arith.constant 0 : index
      %c0_15 = arith.constant 0 : index
      %40 = vector.load %arg5[%c0_14, %c0_15] : memref<8x512xf32, #tpu.memory_space<vmem>>, vector<8x512xf32>
      tpu.vector_store %arg5[%c0_14, %c0_15], %39 {strides = array<i32>} : memref<8x512xf32, #tpu.memory_space<vmem>>, vector<8x512xf32>,
    } else {
    }
    %c0 = arith.constant 0 : index
    %c0_1 = arith.constant 0 : index
    %3 = vector.load %arg2[%c0, %c0_1] : memref<8x512xf32, #tpu.memory_space<vmem>>, vector<8x512xf32>
    %c0_2 = arith.constant 0 : index
    %c0_3 = arith.constant 0 : index
    %4 = vector.load %arg3[%c0_2, %c0_3] : memref<8x512xf32, #tpu.memory_space<vmem>>, vector<8x512xf32>
    %cst = arith.constant 1.500000e-01 : f32
    %5 = vector.broadcast %cst : f32 to vector<8x512xf32>
    %6 = arith.cmpf ogt, %4, %5 : vector<8x512xf32>
    %7 = arith.extui %6 : vector<8x512xi1> to vector<8x512xi32>
    %8 = arith.sitofp %7 : vector<8x512xi32> to vector<8x512xf32>
    %cst_4 = arith.constant 0.000000e+00 : f32
    %9 = vector.broadcast %cst_4 : f32 to vector<8x512xf32>
    %10 = arith.maximumf %3, %9 : vector<8x512xf32>
    %11 = arith.mulf %3, %8 : vector<8x512xf32>
    %12 = arith.subf %10, %11 : vector<8x512xf32>
    %13 = math.absf %3 : vector<8x512xf32>
    %cst_5 = arith.constant 0.000000e+00 : f32
    %14 = vector.broadcast %cst_5 : f32 to vector<8x512xf32>
    %15 = arith.subf %14, %13 : vector<8x512xf32>
    %16 = math.exp %15 : vector<8x512xf32>
    %17 = math.log1p %16 : vector<8x512xf32>
    %18 = arith.addf %12, %17 : vector<8x512xf32>
    %c1_i32 = arith.constant 1 : i32
    %19 = arith.muli %arg0, %c1_i32 : i32
    %20 = arith.addi %19, %arg1 : i32
    %c8_i32 = arith.constant 8 : i32
    %21 = arith.muli %20, %c8_i32 : i32
    %22 = tpu.iota {dimensions = array<i32: 0>} : vector<8x512xi32>
    %23 = tpu.iota {dimensions = array<i32: 1>} : vector<8x512xi32>
    %24 = vector.broadcast %21 : i32 to vector<8x512xi32>
    %25 = arith.addi %24, %22 : vector<8x512xi32>
    %c512_i32 = arith.constant 512 : i32
    %26 = vector.broadcast %c512_i32 : i32 to vector<8x512xi32>
    %27 = arith.muli %25, %26 : vector<8x512xi32>
    %28 = arith.addi %27, %23 : vector<8x512xi32>
    %c256_i32 = arith.constant 256 : i32
    %29 = vector.broadcast %c256_i32 : i32 to vector<8x512xi32>
    %30 = arith.cmpi slt, %28, %29 : vector<8x512xi32>
    %c0_6 = arith.constant 0 : index
    %c0_7 = arith.constant 0 : index
    %31 = vector.load %arg5[%c0_6, %c0_7] : memref<8x512xf32, #tpu.memory_space<vmem>>, vector<8x512xf32>
    %cst_8 = arith.constant 0.000000e+00 : f32
    %32 = vector.broadcast %cst_8 : f32 to vector<8x512xf32>
    %33 = arith.select %30, %18, %32 : vector<8x512xi1>, vector<8x512xf32>
    %34 = arith.addf %31, %33 : vector<8x512xf32>
    %c0_9 = arith.constant 0 : index
    %c0_10 = arith.constant 0 : index
    %35 = vector.load %arg5[%c0_9, %c0_10] : memref<8x512xf32, #tpu.memory_space<vmem>>, vector<8x512xf32>
    tpu.vector_store %arg5[%c0_9, %c0_10], %34 {strides = array<i32>} : memref<8x512xf32, #tpu.memory_space<vmem>>, vector<8x512xf32>,
    %c0_i32_11 = arith.constant 0 : i32
    %36 = arith.cmpi eq, %arg1, %c0_i32_11 : i32
    %37 = arith.extui %36 : i1 to i32
    %c0_i32_12 = arith.constant 0 : i32
    %38 = arith.cmpi ne, %37, %c0_i32_12 : i32
    scf.if %38 {
      %c0_13 = arith.constant 0 : index
      %c0_14 = arith.constant 0 : index
      %39 = vector.load %arg5[%c0_13, %c0_14] : memref<8x512xf32, #tpu.memory_space<vmem>>, vector<8x512xf32>
      %40 = vector.shape_cast %39 : vector<8x512xf32> to vector<1x8x512xf32>
      %cst_15 = arith.constant dense<0.000000e+00> : vector<1xf32>
      %41 = vector.multi_reduction <add>, %40, %cst_15 [1, 2] : vector<1x8x512xf32> to vector<1xf32>
      %42 = vector.shape_cast %41 : vector<1xf32> to vector<1x1x1xf32>
      %43 = vector.extract %42[0, 0, 0] : f32 from vector<1x1x1xf32>
      %44 = vector.broadcast %43 : f32 to vector<1x128xf32>
      %c0_16 = arith.constant 0 : index
      %c0_17 = arith.constant 0 : index
      %45 = vector.load %arg4[%c0_16, %c0_17] : memref<1x128xf32, #tpu.memory_space<vmem>>, vector<1x128xf32>
      tpu.vector_store %arg4[%c0_16, %c0_17], %44 {strides = array<i32>} : memref<1x128xf32, #tpu.memory_space<vmem>>, vector<1x128xf32>,
    } else {
    }
    return
  }
  func.func @transform_0(%arg0: i32, %arg1: i32) -> (i32, i32) {
    %c1_i32 = arith.constant 1 : i32
    %0 = arith.muli %arg0, %c1_i32 : i32
    %1 = arith.addi %0, %arg1 : i32
    %c0_i32 = arith.constant 0 : i32
    %c0_i32_0 = arith.constant 0 : i32
    return %1, %c0_i32 : i32, i32
  }
  func.func @transform_1(%arg0: i32, %arg1: i32) -> (i32, i32) {
    %c1_i32 = arith.constant 1 : i32
    %0 = arith.muli %arg0, %c1_i32 : i32
    %1 = arith.addi %0, %arg1 : i32
    %c0_i32 = arith.constant 0 : i32
    %c0_i32_0 = arith.constant 0 : i32
    return %1, %c0_i32 : i32, i32
  }
  func.func @transform_2(%arg0: i32, %arg1: i32) -> (i32, i32) {
    %c0_i32 = arith.constant 0 : i32
    %c0_i32_0 = arith.constant 0 : i32
    return %c0_i32, %arg0 : i32, i32
  }
}

</mosaic_0001>

<bundles_post_ra>
// kernel: tpu_custom_call.1
= control target key start
LH: loop header
LB: loop body
LE: loop exit
PB: predicated region body
PF: predicated region fallthrough
CT: control target
= control target key end

     0   :  { %7 = vsyncpa [#allocation4], 0  ;;  %s1025_s0 = inlined_call_operand.hbm [shape: f32[16,512], index: 0, kind: input, shape index: {}]   ;;  %s1026_s1 = inlined_call_operand.hbm [shape: f32[16,512], index: 1, kind: input, shape index: {}]   ;;  %s1027_s2 = inlined_call_operand.hbm [shape: f32[1,256], index: 2, kind: output, shape index: {}]  }
   0x1   :  { %9 = vsyncpa [#allocation4 + $0x1], 0 }
   0x2   :  { %10 = vsyncpa [#allocation7], 0 }
   0x3   :  { %12 = vsyncpa [#allocation7 + $0x1], 0 }
   0x4   :  { %13 = vsyncpa [#allocation5], 0 }
   0x5   :  { %15 = vsyncpa [#allocation5 + $0x1], 0  ;;  %s758_s9 = smov 0   ;;  %s760_s10 = smov 0  }
   0x6   :  { %s762_s11 = smov 0   ;;  %s764_s12 = smov 0  }
   0x7   :  { %s766_s13 = smov 0   ;;  %s768_s14 = smov 0  }
   0x8 LB: > { %s482_s15 = sadd.s32 4294967295, %s737_s14   ;;  %s483_s16 = sadd.s32 4294967294, %s737_s14   ;;  %s737_s14 = sphi %s768_s14, %s21_s14   ;;  %s733_s13 = sphi %s766_s13, %s1051_s13   ;;  %s729_s12 = sphi %s764_s12, %s1050_s12   ;;  %s725_s11 = sphi %s762_s11, %s1049_s11   ;;  %s721_s10 = sphi %s760_s10, %s1048_s10   ;;  %s717_s9 = sphi %s758_s9, %s1047_s9  }
   0x9   : > { %s33_s17 = sadd.s32 1, %s733_s13  ;;  %s42_s18 = sadd.s32 1, %s725_s11 }
   0xa   : > { %p35_p0 = scmp.ge.s32.totalorder %s33_s17, 2  ;;  %p49_p1 = scmp.ne.s32.totalorder %s725_s11, %s721_s10 }
   0xb   : > { %p50_p2 = scmp.eq.s32.totalorder %s737_s14, 0  ;;  %p55_p3 = scmp.ne.s32.totalorder %s721_s10, %s717_s9 }
   0xc   : > { %s1053_s17 = smov (%p35_p0, %s33_s17), 0  ;;  %p56_p5 = scmp.eq.s32.totalorder %s482_s15, 0 }
   0xd   : > { %p799_p4 = por %p50_p2, %p49_p1  ;;  %s39_s20 = ssub.s32 %s733_s13, %s1053_s17 }
   0xe   : > { %p107_p6 = scmp.eq.s32.totalorder %s482_s15, 1  ;;  %p40_p7 = scmp.eq.s32.totalorder %s39_s20, 0 }
   0xf   : > { %p805_p8 = por %p56_p5, %p55_p3  ;;  %p113_p10 = scmp.eq.s32.totalorder %s483_s16, 1 }
  0x10   : > { %p809_p9 = por %p107_p6, %p49_p1  ;;  %p524_p13 = scmp.lt.s32.totalorder %s737_s14, 2 }
  0x11   : > { %s1031_s21 = scalar_select %p805_p8, 1, 0 }
  0x12   : > { %s1032_s22 = scalar_select %p809_p9, 1, 0 }
  0x13   : > { %s814_s23 = scalar_select %p40_p7, %s725_s11, %s42_s18  }
  0x14   : > { %p816_p11 = por %p113_p10, %p55_p3  ;;  %s823_s25 = sand.u32 1, %s725_s11  }
  0x15   : > { %s486_s26 = sshll.u32 %s823_s25, 5  ;;  %s503_s27 = sshll.u32 %s733_s13, 9 }
  0x16   : > { %s1033_s24 = scalar_select %p816_p11, 1, 0 }
  0x17   : > { %s832_s30 = scalar_lea.hbm %s1025_s0, %s503_s27  ;;  %s137_s3 = scalar_lea.vmem [#allocation3], %s486_s26 }
  0x18   : > { %s146_s4 = sshll.u32 %s137_s3, 4  ;;  %p840_p0 = pnand %p524_p13, %p799_p4  ;;  %s836_s4 = int_to_ptr.vmem [resolvable:$true] %s146_s4 }
  0x19   : > { %s134_s6 = scalar_lea.sflag [#allocation4], %s823_s25  ;;  %s591_s7 = scalar_lea.hbm %s832_s30, 512 }
  0x1a   : > { %p592_p3 = scmp.ne.s32.totalorder %s832_s30, %s591_s7  ;;  %p593_p5 = pneg %p840_p0 }
  0x1b   : > { %s596_s16 = scalar_lea.hbm %s1025_s0, 1024  ;;  %p597_p4 = scmp.lt.u32.totalorder %s832_s30, %s1025_s0 }
  0x1c   : > { %p594_p6 = pnand %p593_p5, %p592_p3  ;;  %p598_p10 = scmp.lt.u32.totalorder %s596_s16, %s591_s7 }
  0x1d   : > { %p600_p12 = scmp.lt.u32.totalorder %s591_s7, %s832_s30 }
  0x1e   : > { %p595_p7 = pneg %p594_p6  ;;  %p599_p13 = por %p598_p10, %p597_p4 }
  0x20   : > { %p601_p1 = por %p600_p12, %p599_p13 }
  0x22   : > { %p602_p2 = pnand %p601_p1, %p595_p7 }
  0x24   : > { %605 = shalt.err (!%p602_p2)
}
  0x25   : > { %s606_s20 = scalar_lea.vmem %s836_s4, 512  ;;  %s739_s28 = smov [#allocation3]  }
  0x26   : > { %p607_p3 = scmp.ne.s32.totalorder %s836_s4, %s606_s20  ;;  %s611_s29 = sshll.u32 %s739_s28, 4  ;;  %s612_s29 = int_to_ptr.vmem [resolvable:$false] %s611_s29 }
  0x27   : > { %s613_s3 = scalar_lea.vmem %s612_s29, 1024  ;;  %p614_p9 = scmp.lt.s32.totalorder %s836_s4, %s612_s29 }
  0x28   : > { %p609_p6 = pnand %p607_p3, %p593_p5  ;;  %p615_p4 = scmp.lt.s32.totalorder %s613_s3, %s606_s20 }
  0x2a   : > { %p610_p11 = pneg %p609_p6  ;;  %p616_p10 = por %p615_p4, %p614_p9 }
  0x2c   : > { %p617_p12 = pnand %p616_p10, %p610_p11 }
  0x2e   : > { %620 = shalt.err (!%p617_p12)
}
  0x2f   : > { %516 = dma.hbm_to_vmem [thread:$0]  (!%p840_p0), %s832_s30, 512, %s836_s4, %s134_s6  }
  0x30   : > { %p1035_p1 = scmp.lt.s32.totalorder %s737_s14, 3  ;;  %p1036_p2 = scmp.ge.s32.totalorder %s737_s14, 1 }
  0x31   : > { %s885_s16 = scalar_lea.hbm %s1026_s1, %s503_s27  ;;  %s157_s18 = scalar_lea.vmem [#allocation6], %s486_s26 }
  0x32   : > { %p876_p7 = pnand %p1036_p2, %p1035_p1  ;;  %s166_s19 = sshll.u32 %s157_s18, 4  ;;  %s167_s19 = int_to_ptr.vmem [resolvable:$true] %s166_s19 }
  0x33   : > { %s154_s30 = scalar_lea.sflag [#allocation7], %s823_s25  ;;  %s621_s4 = scalar_lea.hbm %s885_s16, 512 }
  0x34   : > { %s1037_s7 = scalar_select %p876_p7, 1, 0 }
  0x35   : > { %p622_p9 = scmp.ne.s32.totalorder %s885_s16, %s621_s4  ;;  %s626_s27 = scalar_lea.hbm %s1026_s1, 1024 }
  0x36   : > { %p627_p3 = scmp.lt.u32.totalorder %s885_s16, %s1026_s1  ;;  %p628_p6 = scmp.lt.u32.totalorder %s626_s27, %s621_s4 }
  0x37   : > { %p624_p11 = pnand %p622_p9, %p593_p5  ;;  %p630_p10 = scmp.lt.u32.totalorder %s621_s4, %s885_s16 }
  0x38   : > { %p629_p4 = por %p628_p6, %p627_p3 }
  0x39   : > { %p625_p13 = pneg %p624_p11 }
  0x3a   : > { %p631_p12 = por %p630_p10, %p629_p4 }
  0x3c   : > { %p632_p1 = pnand %p631_p12, %p625_p13 }
  0x3e   : > { %635 = shalt.err (!%p632_p1)
}
  0x3f   : > { %s636_s25 = scalar_lea.vmem %s167_s19, 512  ;;  %s740_s26 = smov [#allocation6]  }
  0x40   : > { %p637_p2 = scmp.ne.s32.totalorder %s167_s19, %s636_s25  ;;  %s641_s3 = sshll.u32 %s740_s26, 4  ;;  %s642_s3 = int_to_ptr.vmem [resolvable:$false] %s641_s3 }
  0x41   : > { %s643_s8 = scalar_lea.vmem %s642_s3, 1024  ;;  %p644_p8 = scmp.lt.s32.totalorder %s167_s19, %s642_s3 }
  0x42   : > { %p639_p9 = pnand %p637_p2, %p593_p5  ;;  %p645_p7 = scmp.lt.s32.totalorder %s643_s8, %s636_s25 }
  0x44   : > { %p640_p11 = pneg %p639_p9  ;;  %p646_p3 = por %p645_p7, %p644_p8 }
  0x46   : > { %p647_p6 = pnand %p646_p3, %p640_p11 }
  0x48   : > { %650 = shalt.err (!%p647_p6)
}
  0x49   : > { %519 = dma.hbm_to_vmem [thread:$0]  (!%p840_p0), %s885_s16, 512, %s167_s19, %s154_s30  }
  0x4a   : > { %p1038_p13 = scmp.ne.s32.totalorder %s1037_s7, 0 }
  0x4b   : > { %s912_s15 = sand.u32 (!%p1038_p13), 1, %s721_s10   ;;  %p1039_p5 = scmp.ne.s32.totalorder (!%p1038_p13), %s1031_s21, 0 }
  0x4c   : > { %175 = sbr.rel (%p1038_p13) target bundleno = 349 (0x15d), region = 28  ;;  %s493_s18 = sshll.u32 (!%p1038_p13), %s912_s15, 5 }
  0x4d   : > { %s178_s4 = scalar_lea.sflag (!%p1038_p13), [#allocation4], %s912_s15  ;;  %s181_s6 = scalar_lea.vmem (!%p1038_p13), [#allocation3], %s493_s18 }
  0x53   : > { %704 = dma.done.wait (%p1039_p5), %s178_s4, 512  }
  0x54   : > { %706 = vsyncadd (%p1039_p5), %s178_s4, 4294966784  ;;  %s187_s5 = scalar_lea.sflag [#allocation7], %s912_s15  ;;  %s921_s16 = scalar_lea.vmem [#allocation6], %s493_s18 }
  0x55   : > { %708 = dma.done.wait (%p1039_p5), %s187_s5, 512  }
  0x56   : > { %710 = vsyncadd (%p1039_p5), %s187_s5, 4294966784  ;;  %v927_v0 = vld [vmem:[%s181_s6] sm:$0xff]  ;;  %v929_v1 = vld [vmem:[%s181_s6 + $0x8] sm:$0xff]  ;;  %v315_v16 = vlaneseq  ;;  %s499_s21 = sshll.u32 %s729_s12, 3  ;;  %v741_v35 = vmov 0.0   ;;  %s214_s7 = scalar_lea.vmem [#allocation8], %s912_s15 }
  0x57   : > { %v931_v2 = vld [vmem:[%s181_s6 + $0x10] sm:$0xff]  ;;  %v933_v3 = vld [vmem:[%s181_s6 + $0x18] sm:$0xff]  ;;  %v257_v4 = vand.u32 2147483647, %v927_v0  ;;  %v258_v5 = vand.u32 2147483647, %v929_v1  ;;  %v322_v20 = vstv %s499_s21 }
  0x58   : > { %v259_v6 = vand.u32 2147483647, %v931_v2  ;;  %v260_v7 = vand.u32 2147483647, %v933_v3  ;;  %v316_v17 = vshrl.u32 %v315_v16, 7  ;;  %v318_v18 = vand.u32 127, %v315_v16 }
  0x59   : > { %v261_v8 = vsub.f32 0.0, %v257_v4  ;;  %v262_v9 = vsub.f32 0.0, %v258_v5  ;;  %v229_v19 = vld [vmem:[%s921_s16] sm:$0xff]  ;;  %v230_v22 = vld [vmem:[%s921_s16 + $0x8] sm:$0xff]  ;;  %v231_v24 = vld [vmem:[%s921_s16 + $0x10] sm:$0xff]  ;;  %v245_v44 = vmax.f32 %v927_v0, 0.0 }
  0x5a   : > { %v263_v10 = vsub.f32 0.0, %v259_v6  ;;  %v264_v11 = vsub.f32 0.0, %v260_v7  ;;  %v232_v25 = vld [vmem:[%s921_s16 + $0x18] sm:$0xff]  ;;  %vm233_vm0 = vcmp.gt.f32.partialorder %v229_v19, 0.15  ;;  %v319_v29 = vadd.s32 128, %v318_v18 }
  0x5b   : > { %v265_v12 = vmul.f32 1.442695, %v261_v8  ;;  %v267_v13 = vmul.f32 1.442695, %v262_v9  ;;  %v323_v30 = vadd.s32 %v322_v20, %v316_v17  ;;  %vm234_vm1 = vcmp.gt.f32.partialorder %v230_v22, 0.15 }
  0x5c   : > { %v269_v14 = vmul.f32 1.442695, %v263_v10  ;;  %v271_v15 = vmul.f32 1.442695, %v264_v11  ;;  %v320_v33 = vadd.s32 256, %v318_v18  ;;  %v495_v36 = vsel %vm233_vm0, 1.0, %v741_v35 }
  0x5d   : > { %575 = vpow2.f32 %v265_v12  ;;  %vm235_vm2 = vcmp.gt.f32.partialorder %v231_v24, 0.15  ;;  %vm236_vm3 = vcmp.gt.f32.partialorder %v232_v25, 0.15  ;;  %v496_v39 = vsel %vm234_vm1, 1.0, %v741_v35  ;;  %s383_s19 = sshll.u32 %s214_s7, 4  ;;  %s973_s19 = int_to_ptr.vmem [resolvable:$true] %s383_s19 }
  0x5e   : > { %577 = vpow2.f32 %v267_v13  ;;  %v321_v41 = vadd.s32 384, %v318_v18  ;;  %v324_v42 = vmul.u32 512, %v323_v30  ;;  %v497_v43 = vsel %vm235_vm2, 1.0, %v741_v35  ;;  %s500_s30 = sshll.u32 %s729_s12, 4  ;;  %s371_s25 = scalar_lea.sflag [#allocation5], %s912_s15 }
  0x5f   : > { %579 = vpow2.f32 %v269_v14  ;;  %v246_v45 = vmax.f32 %v929_v1, 0.0  ;;  %v498_v46 = vsel %vm236_vm3, 1.0, %v741_v35  ;;  %v249_v47 = vmul.f32 %v495_v36, %v927_v0  ;;  %s978_s29 = scalar_lea.hbm %s1027_s2, %s500_s30  ;;  %s651_s26 = scalar_lea.vmem %s973_s19, 16 }
  0x60   : > { %581 = vpow2.f32 %v271_v15  ;;  %v247_v50 = vmax.f32 %v931_v2, 0.0  ;;  %v250_v51 = vmul.f32 %v496_v39, %v929_v1  ;;  %v251_v54 = vmul.f32 %v497_v43, %v931_v2  ;;  %p652_p8 = scmp.ne.s32.totalorder %s973_s19, %s651_s26  ;;  %p1044_p0 = scmp.ne.s32.totalorder %s1032_s22, 0 }
  0x61   : > { %v325_v57 = vadd.s32 %v324_v42, %v318_v18  ;;  %v248_v58 = vmax.f32 %v933_v3, 0.0  ;;  %v252_v59 = vmul.f32 %v498_v46, %v933_v3  ;;  %v326_v61 = vadd.s32 %v324_v42, %v319_v29  ;;  %s742_s12 = smov [#allocation8]  }
  0x62   : > { %v253_v62 = vsub.f32 %v245_v44, %v249_v47  ;;  %v327_v4 = vadd.s32 %v324_v42, %v320_v33  ;;  %v254_v6 = vsub.f32 %v246_v45, %v250_v51  ;;  %v255_v9 = vsub.f32 %v247_v50, %v251_v54  ;;  %p653_p7 = pnand %p652_p8, %p1044_p0  ;;  %s655_s3 = sshll.u32 %s742_s12, 4  ;;  %s656_s3 = int_to_ptr.vmem [resolvable:$false] %s655_s3 }
  0x63   : > { %v256_v13 = vsub.f32 %v248_v58, %v252_v59  ;;  %v328_v15 = vadd.s32 %v324_v42, %v321_v41  ;;  %vm329_vm7 = vcmp.lt.s32.totalorder %v325_v57, 256  ;;  %vm330_vm9 = vcmp.lt.s32.totalorder %v326_v61, 256  ;;  %s657_s8 = scalar_lea.vmem %s656_s3, 32  ;;  %p658_p10 = scmp.lt.s32.totalorder %s973_s19, %s656_s3 }
  0x64   : > { %vm331_vm10 = vcmp.lt.s32.totalorder %v327_v4, 256  ;;  %p654_p4 = pneg %p653_p7  ;;  %p659_p12 = scmp.lt.s32.totalorder %s657_s8, %s651_s26 }
  0x65   : > { %vm332_vm11 = vcmp.lt.s32.totalorder %v328_v15, 256 }
  0x66   : > { %p660_p1 = por %p659_p12, %p658_p10 }
  0x67   : > { %v576_v21 = vpop.eup %575 }
  0x68   : > { %v578_v23 = vpop.eup %577  ;;  %v273_v26 = vadd.f32 1.0, %v576_v21  ;;  %v276_v34 = vmul.f32 -0.5, %v576_v21  ;;  %v279_v52 = vand.u32 2147483647, %v576_v21  ;;  %p661_p2 = pnand %p660_p1, %p654_p4 }
  0x69   : > { %v580_v27 = vpop.eup %579  ;;  %v282_v28 = vadd.f32 1.0, %v578_v23  ;;  %v285_v37 = vmul.f32 -0.5, %v578_v23  ;;  %v288_v55 = vand.u32 2147483647, %v578_v23 }
  0x6a   : > { %v944_v31 = vpop.eup %581  ;;  %583 = vlog2.f32 %v273_v26  ;;  %v291_v32 = vadd.f32 1.0, %v580_v27  ;;  %v294_v40 = vmul.f32 -0.5, %v580_v27  ;;  %v277_v48 = vadd.f32 1.0, %v276_v34 }
  0x6b   : > { %585 = vlog2.f32 %v282_v28  ;;  %v300_v38 = vadd.f32 1.0, %v944_v31  ;;  %v303_v49 = vmul.f32 -0.5, %v944_v31  ;;  %v286_v53 = vadd.f32 1.0, %v285_v37 }
  0x6c   : > { %587 = vlog2.f32 %v291_v32  ;;  %v295_v56 = vadd.f32 1.0, %v294_v40  ;;  %v297_v60 = vand.u32 2147483647, %v580_v27  ;;  %v278_v63 = vmul.f32 %v576_v21, %v277_v48 }
  0x6d   : > { %589 = vlog2.f32 %v300_v38  ;;  %v304_v0 = vadd.f32 1.0, %v303_v49  ;;  %vm957_vm4 = vcmp.lt.f32.partialorder %v279_v52, 0.0004427343  ;;  %v287_v2 = vmul.f32 %v578_v23, %v286_v53 }
  0x6e   : > { %v306_v7 = vand.u32 2147483647, %v944_v31  ;;  %vm962_vm5 = vcmp.lt.f32.partialorder %v288_v55, 0.0004427343  ;;  %v296_v11 = vmul.f32 %v580_v27, %v295_v56  ;;  %vm298_vm6 = vcmp.lt.f32.partialorder %v297_v60, 0.0004427343 }
  0x6f   : > { %v305_v18 = vmul.f32 %v944_v31, %v304_v0 }
  0x70   : > { %vm307_vm8 = vcmp.lt.f32.partialorder %v306_v7, 0.0004427343 }
  0x74   : > { %v584_v5 = vpop.eup %583 }
  0x75   : > { %v586_v8 = vpop.eup %585  ;;  %v275_v10 = vmul.f32 0.6931472, %v584_v5 }
  0x76   : > { %v588_v12 = vpop.eup %587  ;;  %v284_v14 = vmul.f32 0.6931472, %v586_v8 }
  0x77   : > { %v281_v16 = vsel %vm957_vm4, %v278_v63, %v275_v10  ;;  %v293_v17 = vmul.f32 0.6931472, %v588_v12  ;;  %v590_v19 = vpop.eup %589 }
  0x78   : > { %v290_v20 = vsel %vm962_vm5, %v287_v2, %v284_v14  ;;  %v309_v21 = vadd.f32 %v281_v16, %v253_v62  ;;  %v302_v23 = vmul.f32 0.6931472, %v590_v19 }
  0x79   : > { %v299_v22 = vsel %vm298_vm6, %v296_v11, %v293_v17  ;;  %v310_v24 = vadd.f32 %v290_v20, %v254_v6 }
  0x7a   : > { %v311_v25 = vadd.f32 %v299_v22, %v255_v9  ;;  %v337_v26 = vsel %vm329_vm7, %v309_v21, 0.0  ;;  %v308_v27 = vsel %vm307_vm8, %v305_v18, %v302_v23 }
  0x7b   : > { %v338_v28 = vsel %vm330_vm9, %v310_v24, 0.0  ;;  %v312_v29 = vadd.f32 %v308_v27, %v256_v13 }
  0x7c   : > { %v339_v30 = vsel %vm331_vm10, %v311_v25, 0.0  ;;  %v356_v31 = vadd.f32 %v338_v28, %v337_v26 }
  0x7d   : > { %v340_v32 = vsel %vm332_vm11, %v312_v29, 0.0 }
  0x7e   : > { %v357_v33 = vadd.f32 %v356_v31, %v339_v30 }
  0x80   : > { %v358_v34 = vadd.f32 %v357_v33, %v340_v32 }
  0x82   : > { %359 = vadd.xlane.f32.xlu0 %v358_v34 }
 0x10f   : > { %v360_v35 = vpop.xlane.xlu0 %359 }
 0x110   : > { %v361_v36 = vrot.slane %v360_v35, 4 }
 0x112   : > { %v362_v37 = vadd.f32 %v361_v36, %v360_v35 }
 0x114   : > { %v363_v38 = vrot.slane %v362_v37, 2 }
 0x116   : > { %v364_v39 = vadd.f32 %v363_v38, %v362_v37 }
 0x118   : > { %v365_v40 = vrot.slane %v364_v39, 1 }
 0x11a   : > { %v366_v41 = vadd.f32 %v365_v40, %v364_v39 }
 0x11c   : > { %505 = vpush %v366_v41 }
 0x14d   : > { %s506_s20 = spop %505 }
 0x14e   : > { %v368_v42 = vstv %s506_s20 }
 0x14f   : > { %369 = vst [vmem:[%s214_s7] sm:$0x1] %v368_v42 }
 0x150   : > { %664 = shalt.err (!%p661_p2)
}
 0x151   : > { %s665_s15 = scalar_lea.hbm %s978_s29, 16  ;;  %s669_s6 = scalar_lea.hbm %s1027_s2, 32 }
 0x152   : > { %p666_p9 = scmp.ne.s32.totalorder %s978_s29, %s665_s15  ;;  %p670_p6 = scmp.lt.u32.totalorder %s978_s29, %s1027_s2 }
 0x153   : > { %p671_p13 = scmp.lt.u32.totalorder %s669_s6, %s665_s15  ;;  %p673_p8 = scmp.lt.u32.totalorder %s665_s15, %s978_s29 }
 0x154   : > { %p667_p11 = pnand %p666_p9, %p1044_p0 }
 0x155   : > { %p672_p5 = por %p671_p13, %p670_p6 }
 0x156   : > { %p668_p3 = pneg %p667_p11 }
 0x157   : > { %p674_p7 = por %p673_p8, %p672_p5 }
 0x159   : > { %p675_p4 = pnand %p674_p7, %p668_p3 }
 0x15b   : > { %678 = shalt.err (!%p675_p4)
}
 0x15c   : > { %511 = dma.vmem_to_hbm [thread:$0]  (%p1044_p0), %s973_s19, 16, %s978_s29, %s371_s25  }
 0x15d PF: > { %s395_s21 = sand.u32 1, %s717_s9   ;;  %p1045_p10 = scmp.ne.s32.totalorder %s1033_s24, 0 }
 0x15e   : > { %p1046_p12 = scmp.ge.s32.totalorder %s737_s14, 2  ;;  %s396_s7 = scalar_lea.sflag [#allocation5], %s395_s21 }
 0x160   : > { %p521_p1 = pnand %p1046_p12, %p1045_p10 }
 0x162   : > { %712 = dma.done.wait (!%p521_p1), %s396_s7, 16  }
 0x163   : > { %714 = vsyncadd (!%p521_p1), %s396_s7, 4294967280  ;;  %s21_s14 = sadd.s32 1, %s737_s14   ;;  %s1047_s9 = smov %s721_s10 }
 0x164   : > { %p18_p2 = scmp.ge.s32.totalorder %s21_s14, 4   ;;  %s1048_s10 = smov %s725_s11 }
 0x165   : > { %s1049_s11 = smov %s814_s23  ;;  %s1050_s12 = smov %s733_s13 }
 0x166   : > { %s1051_s13 = smov %s1053_s17  ;;  %20 = sbr.rel (!%p18_p2) target bundleno = 8 (0x8), region = 94 }
 0x16d   :  { %400 = vsyncpa [#allocation4], 1 }
 0x16e   :  { %402 = vsyncpa [#allocation4 + $0x1], 1 }
 0x16f   :  { %403 = vsyncpa [#allocation7], 1 }
 0x170   :  { %405 = vsyncpa [#allocation7 + $0x1], 1 }
 0x171   :  { %406 = vsyncpa [#allocation5], 1 }
 0x172   :  { %408 = vsyncpa [#allocation5 + $0x1], 1 }

</bundles_post_ra>
